<compile_context>
chip_gen: v5e
topology: v5e:2x2
jax: 0.10.0
libtpu: 0.0.40
codegen_flags: <defaults>
</compile_context>

<pallas_src>
import math

import numpy as np
import jax
import jax.numpy as jnp
from jax.experimental import pallas as pl
from jax.experimental.pallas import tpu as pltpu

# 48 MiB scoped VMEM: fits v7x (64 MiB physical) with headroom, well below v5e/v6e 128 MiB.
_VMEM_LIMIT = 48 * 1024 * 1024


# ----------------------------------------------------------------------------
# Tiling helpers
# ----------------------------------------------------------------------------
def _round_up(x, m):
    return ((x + m - 1) // m) * m


def _pick_block(dim, preferred, align):
    """Largest block <= preferred that is a multiple of `align` and divides dim.
    Falls back to the full dimension (always a legal block)."""
    if dim <= preferred:
        return dim
    t = (preferred // align) * align
    while t >= align:
        if dim % t == 0:
            return t
        t -= align
    return dim


def _pad_rows(x, bm):
    """Zero-pad the leading (M) axis up to a multiple of bm (robust non-divisible shapes)."""
    m = x.shape[0]
    pad = _round_up(m, bm) - m
    if pad:
        x = jnp.pad(x, ((0, pad), (0, 0)))
    return x


# ----------------------------------------------------------------------------
# Kernel 1: generic tiled linear  y = x @ w_t + b   (x:(M,K), w_t:(K,N), b:(1,N) f32)
# ----------------------------------------------------------------------------
def _linear_kernel(x_ref, wt_ref, b_ref, o_ref, acc_ref):
    @pl.when(pl.program_id(2) == 0)
    def _():
        acc_ref[...] = jnp.zeros_like(acc_ref)

    acc_ref[...] += jnp.dot(x_ref[...], wt_ref[...],
                            preferred_element_type=jnp.float32)

    @pl.when(pl.program_id(2) == pl.num_programs(2) - 1)
    def _():
        o_ref[...] = (acc_ref[...] + b_ref[...]).astype(o_ref.dtype)


def pallas_linear(x, w_t, b, *, out_dtype=None, tm=256, tn=256, tk=512):
    out_dtype = out_dtype or x.dtype
    M, K = x.shape
    Kw, N = w_t.shape
    assert Kw == K
    bm = tm if M >= tm else _round_up(M, 8)
    x_p = _pad_rows(x, bm)
    Mp = x_p.shape[0]
    bn = _pick_block(N, tn, 128)
    bk = _pick_block(K, tk, 128)
    grid = (Mp // bm, N // bn, K // bk)

    cost = pl.CostEstimate(
        flops=2 * Mp * N * K,
        transcendentals=0,
        bytes_accessed=(Mp * K * np.dtype(x.dtype).itemsize
                        + K * N * np.dtype(w_t.dtype).itemsize
                        + N * 4 + Mp * N * np.dtype(out_dtype).itemsize))

    y = pl.pallas_call(
        _linear_kernel,
        out_shape=jax.ShapeDtypeStruct((Mp, N), out_dtype),
        grid_spec=pltpu.PrefetchScalarGridSpec(
            num_scalar_prefetch=0,
            grid=grid,
            in_specs=[
                pl.BlockSpec((bm, bk), lambda i, j, k: (i, k)),
                pl.BlockSpec((bk, bn), lambda i, j, k: (k, j)),
                pl.BlockSpec((1, bn), lambda i, j, k: (0, j)),
            ],
            out_specs=pl.BlockSpec((bm, bn), lambda i, j, k: (i, j)),
            scratch_shapes=[pltpu.VMEM((bm, bn), jnp.float32)],
        ),
        compiler_params=pltpu.CompilerParams(
            dimension_semantics=("parallel", "parallel", "arbitrary"),
            vmem_limit_bytes=_VMEM_LIMIT),
        cost_estimate=cost,
    )(x_p, w_t, b.reshape(1, N).astype(jnp.float32))
    return y[:M] if Mp != M else y


# ----------------------------------------------------------------------------
# Kernel 2: fused QKV projection — x read once, three outputs (q, k, v)
# ----------------------------------------------------------------------------
def _qkv_kernel(x_ref, wq_ref, wk_ref, wv_ref, bq_ref, bk_ref, bv_ref,
                q_out, k_out, v_out, q_acc, k_acc, v_acc):
    @pl.when(pl.program_id(2) == 0)
    def _():
        q_acc[...] = jnp.zeros_like(q_acc)
        k_acc[...] = jnp.zeros_like(k_acc)
        v_acc[...] = jnp.zeros_like(v_acc)

    x = x_ref[...]
    q_acc[...] += jnp.dot(x, wq_ref[...], preferred_element_type=jnp.float32)
    k_acc[...] += jnp.dot(x, wk_ref[...], preferred_element_type=jnp.float32)
    v_acc[...] += jnp.dot(x, wv_ref[...], preferred_element_type=jnp.float32)

    @pl.when(pl.program_id(2) == pl.num_programs(2) - 1)
    def _():
        q_out[...] = (q_acc[...] + bq_ref[...]).astype(q_out.dtype)
        k_out[...] = (k_acc[...] + bk_ref[...]).astype(k_out.dtype)
        v_out[...] = (v_acc[...] + bv_ref[...]).astype(v_out.dtype)


def pallas_qkv_proj(x, wq_t, wk_t, wv_t, bq, bk, bv, *, tm=256, tn=256, tk=512):
    M, K = x.shape
    N = wq_t.shape[1]
    bm = tm if M >= tm else _round_up(M, 8)
    x_p = _pad_rows(x, bm)
    Mp = x_p.shape[0]
    bn = _pick_block(N, tn, 128)
    bkk = _pick_block(K, tk, 128)
    grid = (Mp // bm, N // bn, K // bkk)

    x_spec = pl.BlockSpec((bm, bkk), lambda i, j, k: (i, k))
    w_spec = pl.BlockSpec((bkk, bn), lambda i, j, k: (k, j))
    b_spec = pl.BlockSpec((1, bn), lambda i, j, k: (0, j))
    o_spec = pl.BlockSpec((bm, bn), lambda i, j, k: (i, j))
    o_shape = jax.ShapeDtypeStruct((Mp, N), x.dtype)

    xi = np.dtype(x.dtype).itemsize
    cost = pl.CostEstimate(
        flops=6 * Mp * N * K,
        transcendentals=0,
        bytes_accessed=(Mp * K * xi + 3 * K * N * np.dtype(wq_t.dtype).itemsize
                        + 3 * N * 4 + 3 * Mp * N * xi))

    q, k_, v = pl.pallas_call(
        _qkv_kernel,
        out_shape=(o_shape, o_shape, o_shape),
        grid_spec=pltpu.PrefetchScalarGridSpec(
            num_scalar_prefetch=0,
            grid=grid,
            in_specs=[x_spec, w_spec, w_spec, w_spec, b_spec, b_spec, b_spec],
            out_specs=(o_spec, o_spec, o_spec),
            scratch_shapes=[pltpu.VMEM((bm, bn), jnp.float32)] * 3,
        ),
        compiler_params=pltpu.CompilerParams(
            dimension_semantics=("parallel", "parallel", "arbitrary"),
            vmem_limit_bytes=_VMEM_LIMIT),
        cost_estimate=cost,
    )(x_p, wq_t, wk_t, wv_t,
      bq.reshape(1, N).astype(jnp.float32),
      bk.reshape(1, N).astype(jnp.float32),
      bv.reshape(1, N).astype(jnp.float32))
    if Mp != M:
        q, k_, v = q[:M], k_[:M], v[:M]
    return q, k_, v


# ----------------------------------------------------------------------------
# Kernel 3: flash-attention core over (S, B*H, D) with online softmax.
#   grid = (BH-blocks, Q-blocks, KV-blocks); KV is the reduction axis (last, "arbitrary").
# ----------------------------------------------------------------------------
_NEG_INIT = -1e30  # finite "-inf": fully (-1e9) masked KV blocks never yield mid-scan NaNs


def _make_attn_kernel(with_mask, approx_recip):
    def kernel(*refs):
        if with_mask:
            q_ref, k_ref, v_ref, mask_ref, o_ref, m_sc, l_sc, acc_sc, q_sc = refs
        else:
            q_ref, k_ref, v_ref, o_ref, m_sc, l_sc, acc_sc, q_sc = refs

        kv = pl.program_id(2)

        @pl.when(kv == 0)
        def _():
            m_sc[...] = jnp.full_like(m_sc, _NEG_INIT)
            l_sc[...] = jnp.zeros_like(l_sc)
            acc_sc[...] = jnp.zeros_like(acc_sc)
            # Hoist all ki-invariant q work (load + relayout to batch-leading) out of the
            # KV loop: done once per (head-block, Q-block). 1/sqrt(D) is folded into W_q.
            q_sc[...] = jnp.transpose(
                q_ref[...].astype(jnp.float32), (1, 0, 2)).astype(q_sc.dtype)

        q = q_sc[...]          # (tn, tq, D)  compute dtype (bf16 MXU operands by default)
        k = k_ref[...]         # (tkv, tn, D)
        v = v_ref[...]         # (tkv, tn, D)

        # scores: (tn, tq, tkv), f32 MXU accumulation
        s = jnp.einsum("nqd,knd->nqk", q, k, preferred_element_type=jnp.float32)
        if with_mask:
            s = s + mask_ref[...][None, :, :]

        m_prev = m_sc[...]                                        # (tn, tq, 1) f32
        m_new = jnp.maximum(m_prev, jnp.max(s, axis=-1, keepdims=True))
        alpha = jnp.exp(m_prev - m_new)
        p = jnp.exp(s - m_new)                                    # f32 un-normalized probs
        l_sc[...] = alpha * l_sc[...] + jnp.sum(p, axis=-1, keepdims=True)
        acc_sc[...] = alpha * acc_sc[...] + jnp.einsum(
            "nqk,knd->nqd", p.astype(v.dtype), v, preferred_element_type=jnp.float32)
        m_sc[...] = m_new

        @pl.when(kv == pl.num_programs(2) - 1)
        def _():
            # Normalize AFTER the PV matmul: O(tn*tq*D) not O(tn*tq*tkv); EUP reciprocal.
            out = acc_sc[...] * pl.reciprocal(l_sc[...], approx=approx_recip)
            out = jnp.transpose(out, (1, 0, 2))                   # (tq, tn, D)
            # Lane-dense store: (tq, tn*D) avoids masked partial stores when D < 128.
            o_ref[...] = out.reshape(o_ref.shape).astype(o_ref.dtype)

    return kernel


def pallas_flash_attention(q, k, v, attn_mask, *, tq_pref=256, tkv_pref=256, tn_pref=16):
    S, N, D = q.shape                       # N = B * H
    compute_dtype = q.dtype
    tq = _pick_block(S, tq_pref, 8)
    tkv = _pick_block(S, tkv_pref, 128)
    tn = _pick_block(N, tn_pref, 8)         # head/batch block, multiple of 8
    grid = (N // tn, S // tq, S // tkv)

    with_mask = attn_mask is not None
    in_specs = [
        pl.BlockSpec((tq, tn, D), lambda ni, qi, ki: (qi, ni, 0)),
        pl.BlockSpec((tkv, tn, D), lambda ni, qi, ki: (ki, ni, 0)),
        pl.BlockSpec((tkv, tn, D), lambda ni, qi, ki: (ki, ni, 0)),
    ]
    args = [q, k, v]
    if with_mask:
        in_specs.append(pl.BlockSpec((tq, tkv), lambda ni, qi, ki: (qi, ki)))
        args.append(attn_mask.astype(jnp.float32))

    itemsize = np.dtype(compute_dtype).itemsize
    cost = pl.CostEstimate(
        flops=4 * S * S * N * D,
        transcendentals=S * S * N,
        bytes_accessed=4 * S * N * D * itemsize + (S * S * 4 if with_mask else 0))

    # exact reciprocal only on the f32 bit-accurate validation path
    approx_recip = np.dtype(compute_dtype) != np.dtype(jnp.float32)

    return pl.pallas_call(
        _make_attn_kernel(with_mask, approx_recip),
        out_shape=jax.ShapeDtypeStruct((S, N * D), compute_dtype),
        grid_spec=pltpu.PrefetchScalarGridSpec(
            num_scalar_prefetch=0,
            grid=grid,
            in_specs=in_specs,
            out_specs=pl.BlockSpec((tq, tn * D), lambda ni, qi, ki: (qi, ni)),
            scratch_shapes=[
                pltpu.VMEM((tn, tq, 1), jnp.float32),      # running max
                pltpu.VMEM((tn, tq, 1), jnp.float32),      # running denominator
                pltpu.VMEM((tn, tq, D), jnp.float32),      # output accumulator
                pltpu.VMEM((tn, tq, D), compute_dtype),    # ki-invariant q cache (batch-leading)
            ],
        ),
        compiler_params=pltpu.CompilerParams(
            dimension_semantics=("parallel", "parallel", "arbitrary"),
            vmem_limit_bytes=_VMEM_LIMIT),
        cost_estimate=cost,
    )(*args)


# ----------------------------------------------------------------------------
# TorchMHA forward:  nn.MultiheadAttention(E, H, dropout=0.1, bias=True,
#                    batch_first=False)(x, x, x, attn_mask, need_weights=False)
# ----------------------------------------------------------------------------
def mha_forward(params, x, attn_mask=None, compute_dtype=jnp.bfloat16):
    """x: (S, B, E). Returns (attn_output (S, B, E), None) — need_weights=False.

    compute_dtype: MXU operand dtype (bf16 default; pass jnp.float32 for bit-accurate
    validation).  All matmul accumulation and softmax statistics are f32 regardless.
    """
    S, B, E = x.shape
    H = params["num_heads"]
    assert E % H == 0
    D = E // H
    scale = 1.0 / math.sqrt(D)

    # One-time weight re-layout to (K, N); fold 1/sqrt(D) into the Q projection (free).
    w_in_t = params["in_proj_weight"].T                              # (E, 3E)
    wq_t = (w_in_t[:, :E] * scale).astype(compute_dtype)
    wk_t = w_in_t[:, E:2 * E].astype(compute_dtype)
    wv_t = w_in_t[:, 2 * E:].astype(compute_dtype)
    bq, bk, bv = jnp.split(params["in_proj_bias"], 3)
    bq = bq * scale
    wo_t = params["out_proj_weight"].T.astype(compute_dtype)         # (E, E)

    x2d = x.reshape(S * B, E).astype(compute_dtype)

    # Fused QKV projection: x read once, three lane-dense outputs in compute_dtype.
    q, k, v = pallas_qkv_proj(x2d, wq_t, wk_t, wv_t, bq, bk, bv)

    # Head split is a free contiguous reshape; no HBM transpose.
    q = q.reshape(S, B * H, D)
    k = k.reshape(S, B * H, D)
    v = v.reshape(S, B * H, D)

    ctx = pallas_flash_attention(q, k, v, attn_mask)                 # (S, (B*H)*D) lane-dense

    # (S, B*E) and (S*B, E) share the same row-major layout: free reshape, then out-proj.
    out = pallas_linear(ctx.reshape(S * B, E), wo_t, params["out_proj_bias"],
                        out_dtype=x.dtype)
    return out.reshape(S, B, E), None   # need_weights=False -> weights are None


# ----------------------------------------------------------------------------
# Pure-JAX reference for correctness checks
# ----------------------------------------------------------------------------
def mha_reference(params, x, attn_mask=None):
    S, B, E = x.shape
    H = params["num_heads"]
    D = E // H
    scale = 1.0 / math.sqrt(D)

    qkv = x.reshape(S * B, E) @ params["in_proj_weight"].T + params["in_proj_bias"]
    q, k, v = jnp.split(qkv, 3, axis=-1)

    def to_heads(t):
        return jnp.transpose(t.reshape(S, B * H, D), (1, 0, 2))

    q, k, v = to_heads(q), to_heads(k), to_heads(v)
    s = jnp.einsum("bqd,bkd->bqk", q, k) * scale
    if attn_mask is not None:
        s = s + attn_mask[None, :, :]
    p = jax.nn.softmax(s, axis=-1)
    ctx = jnp.einsum("bqk,bkd->bqd", p, v)
    ctx = jnp.transpose(ctx, (1, 0, 2)).reshape(S * B, E)
    out = ctx @ params["out_proj_weight"].T + params["out_proj_bias"]
    return out.reshape(S, B, E)


def init_params(key, hidden_size, num_heads):
    k1, k2, k3, k4 = jax.random.split(key, 4)
    scale = 1.0 / math.sqrt(hidden_size)
    return {
        "num_heads": num_heads,
        # nn.MultiheadAttention parameter shapes:
        "in_proj_weight": jax.random.normal(k1, (3 * hidden_size, hidden_size), jnp.float32) * scale,
        "in_proj_bias": jax.random.normal(k3, (3 * hidden_size,), jnp.float32) * 0.1,
        "out_proj_weight": jax.random.normal(k2, (hidden_size, hidden_size), jnp.float32) * scale,
        "out_proj_bias": jax.random.normal(k4, (hidden_size,), jnp.float32) * 0.1,
    }


if __name__ == "__main__":
    SEQ, BATCH, HIDDEN, HEADS = 8, 2, 32, 4

    key = jax.random.PRNGKey(0)
    kx, kp = jax.random.split(key)
    x = jax.random.normal(kx, (SEQ, BATCH, HIDDEN), jnp.float32)  # (S, B, E), batch_first=False
    params = init_params(kp, HIDDEN, HEADS)

    # ---- no-mask path ----
    ref = mha_reference(params, x, attn_mask=None)

    out_f32, _ = mha_forward(params, x, attn_mask=None, compute_dtype=jnp.float32)
    out_f32 = jax.block_until_ready(out_f32)
    assert out_f32.shape == (SEQ, BATCH, HIDDEN)
    assert jnp.allclose(out_f32, ref, atol=1e-4, rtol=1e-4), "f32 no-mask mismatch vs reference"

    out_bf16, _ = mha_forward(params, x, attn_mask=None)          # bf16 MXU operands (default)
    out_bf16 = jax.block_until_ready(out_bf16)
    assert jnp.allclose(out_bf16, ref, atol=1e-1, rtol=1e-1), "bf16 no-mask mismatch vs reference"

    # ---- additive float (causal) mask path ----
    causal = jnp.where(jnp.tril(jnp.ones((SEQ, SEQ), dtype=bool)), 0.0, -1e9).astype(jnp.float32)
    ref_m = mha_reference(params, x, attn_mask=causal)

    out_m, _ = mha_forward(params, x, attn_mask=causal, compute_dtype=jnp.float32)
    out_m = jax.block_until_ready(out_m)
    assert jnp.allclose(out_m, ref_m, atol=1e-4, rtol=1e-4), "f32 masked mismatch vs reference"

    out_m16, _ = mha_forward(params, x, attn_mask=causal)
    out_m16 = jax.block_until_ready(out_m16)
    assert jnp.allclose(out_m16, ref_m, atol=1e-1, rtol=1e-1), "bf16 masked mismatch vs reference"

    print("KERNEL_OK")
</pallas_src>

<mosaic_0001>
module attributes {stable_mosaic.version = 11 : i64} {
  func.func @_qkv_kernel(%arg0: i32, %arg1: i32, %arg2: i32, %arg3: memref<16x32xf32, #tpu.memory_space<vmem>>, %arg4: memref<32x32xf32, #tpu.memory_space<vmem>>, %arg5: memref<32x32xf32, #tpu.memory_space<vmem>>, %arg6: memref<32x32xf32, #tpu.memory_space<vmem>>, %arg7: memref<1x32xf32, #tpu.memory_space<vmem>>, %arg8: memref<1x32xf32, #tpu.memory_space<vmem>>, %arg9: memref<1x32xf32, #tpu.memory_space<vmem>>, %arg10: memref<16x32xf32, #tpu.memory_space<vmem>>, %arg11: memref<16x32xf32, #tpu.memory_space<vmem>>, %arg12: memref<16x32xf32, #tpu.memory_space<vmem>>, %arg13: memref<16x32xf32, #tpu.memory_space<vmem>>, %arg14: memref<16x32xf32, #tpu.memory_space<vmem>>, %arg15: memref<16x32xf32, #tpu.memory_space<vmem>>) attributes {dimension_semantics = [#tpu.dimension_semantics<parallel>, #tpu.dimension_semantics<parallel>, #tpu.dimension_semantics<arbitrary>], iteration_bounds = array<i64: 1, 1, 1>, scalar_prefetch = 0 : i64, scratch_operands = 3 : i64, tpu.core_type = #tpu.core_type<tc>, window_params = [{transform_indices = @transform_0, window_bounds = array<i64: 16, 32>}, {transform_indices = @transform_1, window_bounds = array<i64: 32, 32>}, {transform_indices = @transform_2, window_bounds = array<i64: 32, 32>}, {transform_indices = @transform_3, window_bounds = array<i64: 32, 32>}, {transform_indices = @transform_4, window_bounds = array<i64: 1, 32>}, {transform_indices = @transform_5, window_bounds = array<i64: 1, 32>}, {transform_indices = @transform_6, window_bounds = array<i64: 1, 32>}, {transform_indices = @transform_7, window_bounds = array<i64: 16, 32>}, {transform_indices = @transform_8, window_bounds = array<i64: 16, 32>}, {transform_indices = @transform_9, window_bounds = array<i64: 16, 32>}]} {
    %c0_i32 = arith.constant 0 : i32
    %0 = arith.cmpi eq, %arg2, %c0_i32 : i32
    %1 = arith.extui %0 : i1 to i32
    %c0_i32_0 = arith.constant 0 : i32
    %2 = arith.cmpi ne, %1, %c0_i32_0 : i32
    scf.if %2 {
      %cst_24 = arith.constant 0.000000e+00 : f32
      %22 = vector.broadcast %cst_24 : f32 to vector<16x32xf32>
      %c0_25 = arith.constant 0 : index
      %c0_26 = arith.constant 0 : index
      %23 = vector.load %arg13[%c0_25, %c0_26] : memref<16x32xf32, #tpu.memory_space<vmem>>, vector<16x32xf32>
      tpu.vector_store %arg13[%c0_25, %c0_26], %22 {strides = array<i32>} : memref<16x32xf32, #tpu.memory_space<vmem>>, vector<16x32xf32>,
      %cst_27 = arith.constant 0.000000e+00 : f32
      %24 = vector.broadcast %cst_27 : f32 to vector<16x32xf32>
      %c0_28 = arith.constant 0 : index
      %c0_29 = arith.constant 0 : index
      %25 = vector.load %arg14[%c0_28, %c0_29] : memref<16x32xf32, #tpu.memory_space<vmem>>, vector<16x32xf32>
      tpu.vector_store %arg14[%c0_28, %c0_29], %24 {strides = array<i32>} : memref<16x32xf32, #tpu.memory_space<vmem>>, vector<16x32xf32>,
      %cst_30 = arith.constant 0.000000e+00 : f32
      %26 = vector.broadcast %cst_30 : f32 to vector<16x32xf32>
      %c0_31 = arith.constant 0 : index
      %c0_32 = arith.constant 0 : index
      %27 = vector.load %arg15[%c0_31, %c0_32] : memref<16x32xf32, #tpu.memory_space<vmem>>, vector<16x32xf32>
      tpu.vector_store %arg15[%c0_31, %c0_32], %26 {strides = array<i32>} : memref<16x32xf32, #tpu.memory_space<vmem>>, vector<16x32xf32>,
    } else {
    }
    %c0 = arith.constant 0 : index
    %c0_1 = arith.constant 0 : index
    %3 = vector.load %arg3[%c0, %c0_1] : memref<16x32xf32, #tpu.memory_space<vmem>>, vector<16x32xf32>
    %c0_2 = arith.constant 0 : index
    %c0_3 = arith.constant 0 : index
    %4 = vector.load %arg13[%c0_2, %c0_3] : memref<16x32xf32, #tpu.memory_space<vmem>>, vector<16x32xf32>
    %c0_4 = arith.constant 0 : index
    %c0_5 = arith.constant 0 : index
    %5 = vector.load %arg4[%c0_4, %c0_5] : memref<32x32xf32, #tpu.memory_space<vmem>>, vector<32x32xf32>
    %cst = arith.constant dense<0.000000e+00> : vector<16x32xf32>
    %6 = tpu.matmul %3, %5, %cst {dimension_numbers = #tpu.dot_dimension_numbers<[1], [0], [0], [1], [0, 0, 1, 1], [], []>} : vector<16x32xf32>, vector<32x32xf32>, vector<16x32xf32> -> vector<16x32xf32>
    %7 = arith.addf %4, %6 : vector<16x32xf32>
    %c0_6 = arith.constant 0 : index
    %c0_7 = arith.constant 0 : index
    %8 = vector.load %arg13[%c0_6, %c0_7] : memref<16x32xf32, #tpu.memory_space<vmem>>, vector<16x32xf32>
    tpu.vector_store %arg13[%c0_6, %c0_7], %7 {strides = array<i32>} : memref<16x32xf32, #tpu.memory_space<vmem>>, vector<16x32xf32>,
    %c0_8 = arith.constant 0 : index
    %c0_9 = arith.constant 0 : index
    %9 = vector.load %arg14[%c0_8, %c0_9] : memref<16x32xf32, #tpu.memory_space<vmem>>, vector<16x32xf32>
    %c0_10 = arith.constant 0 : index
    %c0_11 = arith.constant 0 : index
    %10 = vector.load %arg5[%c0_10, %c0_11] : memref<32x32xf32, #tpu.memory_space<vmem>>, vector<32x32xf32>
    %cst_12 = arith.constant dense<0.000000e+00> : vector<16x32xf32>
    %11 = tpu.matmul %3, %10, %cst_12 {dimension_numbers = #tpu.dot_dimension_numbers<[1], [0], [0], [1], [0, 0, 1, 1], [], []>} : vector<16x32xf32>, vector<32x32xf32>, vector<16x32xf32> -> vector<16x32xf32>
    %12 = arith.addf %9, %11 : vector<16x32xf32>
    %c0_13 = arith.constant 0 : index
    %c0_14 = arith.constant 0 : index
    %13 = vector.load %arg14[%c0_13, %c0_14] : memref<16x32xf32, #tpu.memory_space<vmem>>, vector<16x32xf32>
    tpu.vector_store %arg14[%c0_13, %c0_14], %12 {strides = array<i32>} : memref<16x32xf32, #tpu.memory_space<vmem>>, vector<16x32xf32>,
    %c0_15 = arith.constant 0 : index
    %c0_16 = arith.constant 0 : index
    %14 = vector.load %arg15[%c0_15, %c0_16] : memref<16x32xf32, #tpu.memory_space<vmem>>, vector<16x32xf32>
    %c0_17 = arith.constant 0 : index
    %c0_18 = arith.constant 0 : index
    %15 = vector.load %arg6[%c0_17, %c0_18] : memref<32x32xf32, #tpu.memory_space<vmem>>, vector<32x32xf32>
    %cst_19 = arith.constant dense<0.000000e+00> : vector<16x32xf32>
    %16 = tpu.matmul %3, %15, %cst_19 {dimension_numbers = #tpu.dot_dimension_numbers<[1], [0], [0], [1], [0, 0, 1, 1], [], []>} : vector<16x32xf32>, vector<32x32xf32>, vector<16x32xf32> -> vector<16x32xf32>
    %17 = arith.addf %14, %16 : vector<16x32xf32>
    %c0_20 = arith.constant 0 : index
    %c0_21 = arith.constant 0 : index
    %18 = vector.load %arg15[%c0_20, %c0_21] : memref<16x32xf32, #tpu.memory_space<vmem>>, vector<16x32xf32>
    tpu.vector_store %arg15[%c0_20, %c0_21], %17 {strides = array<i32>} : memref<16x32xf32, #tpu.memory_space<vmem>>, vector<16x32xf32>,
    %c0_i32_22 = arith.constant 0 : i32
    %19 = arith.cmpi eq, %arg2, %c0_i32_22 : i32
    %20 = arith.extui %19 : i1 to i32
    %c0_i32_23 = arith.constant 0 : i32
    %21 = arith.cmpi ne, %20, %c0_i32_23 : i32
    scf.if %21 {
      %c0_24 = arith.constant 0 : index
      %c0_25 = arith.constant 0 : index
      %22 = vector.load %arg13[%c0_24, %c0_25] : memref<16x32xf32, #tpu.memory_space<vmem>>, vector<16x32xf32>
      %c0_26 = arith.constant 0 : index
      %c0_27 = arith.constant 0 : index
      %23 = vector.load %arg7[%c0_26, %c0_27] : memref<1x32xf32, #tpu.memory_space<vmem>>, vector<1x32xf32>
      %24 = vector.broadcast %23 : vector<1x32xf32> to vector<16x32xf32>
      %25 = arith.addf %22, %24 : vector<16x32xf32>
      %c0_28 = arith.constant 0 : index
      %c0_29 = arith.constant 0 : index
      %26 = vector.load %arg10[%c0_28, %c0_29] : memref<16x32xf32, #tpu.memory_space<vmem>>, vector<16x32xf32>
      tpu.vector_store %arg10[%c0_28, %c0_29], %25 {strides = array<i32>} : memref<16x32xf32, #tpu.memory_space<vmem>>, vector<16x32xf32>,
      %c0_30 = arith.constant 0 : index
      %c0_31 = arith.constant 0 : index
      %27 = vector.load %arg14[%c0_30, %c0_31] : memref<16x32xf32, #tpu.memory_space<vmem>>, vector<16x32xf32>
      %c0_32 = arith.constant 0 : index
      %c0_33 = arith.constant 0 : index
      %28 = vector.load %arg8[%c0_32, %c0_33] : memref<1x32xf32, #tpu.memory_space<vmem>>, vector<1x32xf32>
      %29 = vector.broadcast %28 : vector<1x32xf32> to vector<16x32xf32>
      %30 = arith.addf %27, %29 : vector<16x32xf32>
      %c0_34 = arith.constant 0 : index
      %c0_35 = arith.constant 0 : index
      %31 = vector.load %arg11[%c0_34, %c0_35] : memref<16x32xf32, #tpu.memory_space<vmem>>, vector<16x32xf32>
      tpu.vector_store %arg11[%c0_34, %c0_35], %30 {strides = array<i32>} : memref<16x32xf32, #tpu.memory_space<vmem>>, vector<16x32xf32>,
      %c0_36 = arith.constant 0 : index
      %c0_37 = arith.constant 0 : index
      %32 = vector.load %arg15[%c0_36, %c0_37] : memref<16x32xf32, #tpu.memory_space<vmem>>, vector<16x32xf32>
      %c0_38 = arith.constant 0 : index
      %c0_39 = arith.constant 0 : index
      %33 = vector.load %arg9[%c0_38, %c0_39] : memref<1x32xf32, #tpu.memory_space<vmem>>, vector<1x32xf32>
      %34 = vector.broadcast %33 : vector<1x32xf32> to vector<16x32xf32>
      %35 = arith.addf %32, %34 : vector<16x32xf32>
      %c0_40 = arith.constant 0 : index
      %c0_41 = arith.constant 0 : index
      %36 = vector.load %arg12[%c0_40, %c0_41] : memref<16x32xf32, #tpu.memory_space<vmem>>, vector<16x32xf32>
      tpu.vector_store %arg12[%c0_40, %c0_41], %35 {strides = array<i32>} : memref<16x32xf32, #tpu.memory_space<vmem>>, vector<16x32xf32>,
    } else {
    }
    return
  }
  func.func @transform_0(%arg0: i32, %arg1: i32, %arg2: i32) -> (i32, i32) {
    %c0_i32 = arith.constant 0 : i32
    return %arg0, %arg2 : i32, i32
  }
  func.func @transform_1(%arg0: i32, %arg1: i32, %arg2: i32) -> (i32, i32) {
    %c0_i32 = arith.constant 0 : i32
    return %arg2, %arg1 : i32, i32
  }
  func.func @transform_2(%arg0: i32, %arg1: i32, %arg2: i32) -> (i32, i32) {
    %c0_i32 = arith.constant 0 : i32
    return %arg2, %arg1 : i32, i32
  }
  func.func @transform_3(%arg0: i32, %arg1: i32, %arg2: i32) -> (i32, i32) {
    %c0_i32 = arith.constant 0 : i32
    return %arg2, %arg1 : i32, i32
  }
  func.func @transform_4(%arg0: i32, %arg1: i32, %arg2: i32) -> (i32, i32) {
    %c0_i32 = arith.constant 0 : i32
    %c0_i32_0 = arith.constant 0 : i32
    return %c0_i32, %arg1 : i32, i32
  }
  func.func @transform_5(%arg0: i32, %arg1: i32, %arg2: i32) -> (i32, i32) {
    %c0_i32 = arith.constant 0 : i32
    %c0_i32_0 = arith.constant 0 : i32
    return %c0_i32, %arg1 : i32, i32
  }
  func.func @transform_6(%arg0: i32, %arg1: i32, %arg2: i32) -> (i32, i32) {
    %c0_i32 = arith.constant 0 : i32
    %c0_i32_0 = arith.constant 0 : i32
    return %c0_i32, %arg1 : i32, i32
  }
  func.func @transform_7(%arg0: i32, %arg1: i32, %arg2: i32) -> (i32, i32) {
    %c0_i32 = arith.constant 0 : i32
    return %arg0, %arg1 : i32, i32
  }
  func.func @transform_8(%arg0: i32, %arg1: i32, %arg2: i32) -> (i32, i32) {
    %c0_i32 = arith.constant 0 : i32
    return %arg0, %arg1 : i32, i32
  }
  func.func @transform_9(%arg0: i32, %arg1: i32, %arg2: i32) -> (i32, i32) {
    %c0_i32 = arith.constant 0 : i32
    return %arg0, %arg1 : i32, i32
  }
}

</mosaic_0001>

<bundles_post_ra>
// kernel: tpu_custom_call.1
= control target key start
LH: loop header
LB: loop body
LE: loop exit
PB: predicated region body
PF: predicated region fallthrough
CT: control target
= control target key end

     0   :  { %15 = vsyncpa [#allocation6], 0  ;;  %s638_s0 = inlined_call_operand.hbm [shape: f32[16,32], index: 0, kind: input, shape index: {}]   ;;  %s639_s1 = inlined_call_operand.hbm [shape: f32[32,32], index: 1, kind: input, shape index: {}]   ;;  %s640_s2 = inlined_call_operand.hbm [shape: f32[32,32], index: 2, kind: input, shape index: {}]   ;;  %s641_s3 = inlined_call_operand.hbm [shape: f32[32,32], index: 3, kind: input, shape index: {}]   ;;  %s642_s4 = inlined_call_operand.vmem [shape: f32[1,32], index: 4, kind: input, shape index: {}]   ;;  %s643_s5 = inlined_call_operand.vmem [shape: f32[1,32], index: 5, kind: input, shape index: {}]   ;;  %s644_s6 = inlined_call_operand.vmem [shape: f32[1,32], index: 6, kind: input, shape index: {}]   ;;  %s645_s7 = inlined_call_operand.hbm [shape: f32[16,32], index: 7, kind: output, shape index: {0}]   ;;  %s646_s8 = inlined_call_operand.hbm [shape: f32[16,32], index: 8, kind: output, shape index: {1}]   ;;  %s647_s9 = inlined_call_operand.hbm [shape: f32[16,32], index: 9, kind: output, shape index: {2}]  }
   0x1   :  { %16 = vsyncpa [#allocation9], 0 }
   0x2   :  { %17 = vsyncpa [#allocation12], 0 }
   0x3   :  { %18 = vsyncpa [#allocation7], 0 }
   0x4   :  { %19 = vsyncpa [#allocation15], 0  ;;  %s37_s11 = sshll.u32 %s639_s1, 4  ;;  %s503_s12 = smov [#allocation8]   ;;  %s38_s11 = int_to_ptr.hbm [resolvable:$true] %s37_s11 }
   0x5   :  { %s39_s13 = sshll.u32 %s503_s12, 4  ;;  %s24_s16 = sshll.u32 %s638_s0, 4  ;;  %s40_s13 = int_to_ptr.vmem [resolvable:$true] %s39_s13  ;;  %s25_s16 = int_to_ptr.hbm [resolvable:$true] %s24_s16 }
   0x6   :  { %s504_s17 = smov 128   ;;  %s505_s18 = smov 8  }
   0x7   :  { %45 = dma.hbm_to_vmem [thread:$0]  %s38_s11, 512, %s40_s13, [#allocation9], %s504_s17, %s504_s17, %s505_s18  }
   0x8   :  { %s506_s19 = smov [#allocation5]   ;;  %s50_s1 = sshll.u32 %s640_s2, 4  ;;  %s51_s1 = int_to_ptr.hbm [resolvable:$true] %s50_s1 }
   0x9   :  { %s26_s20 = sshll.u32 %s506_s19, 4  ;;  %s63_s24 = sshll.u32 %s641_s3, 4  ;;  %s27_s20 = int_to_ptr.vmem [resolvable:$true] %s26_s20  ;;  %s64_s24 = int_to_ptr.hbm [resolvable:$true] %s63_s24 }
   0xa   :  { %32 = dma.hbm_to_vmem [thread:$0]  %s25_s16, 256, %s27_s20, [#allocation6], %s504_s17, %s504_s17, %s505_s18  }
   0xb   :  { %s507_s25 = smov [#allocation10]   ;;  %s508_s27 = smov [#allocation11]  }
   0xc   :  { %s52_s26 = sshll.u32 %s507_s25, 4  ;;  %s65_s2 = sshll.u32 %s508_s27, 4  ;;  %s53_s26 = int_to_ptr.vmem [resolvable:$true] %s52_s26  ;;  %s66_s2 = int_to_ptr.vmem [resolvable:$true] %s65_s2 }
   0xd   :  { %58 = dma.hbm_to_vmem [thread:$0]  %s51_s1, 512, %s53_s26, [#allocation9], %s504_s17, %s504_s17, %s505_s18  }
   0xe   :  { %71 = dma.hbm_to_vmem [thread:$0]  %s64_s24, 512, %s66_s2, [#allocation12], %s504_s17, %s504_s17, %s505_s18  }
   0xf   :  { %493 = dma.done.wait [#allocation6], 256  }
  0x10   :  { %494 = vsyncadd [#allocation6], 4294967040 }
  0x11   :  { %495 = dma.done.wait [#allocation9], 1024  }
  0x12   :  { %496 = vsyncadd [#allocation9], 4294966272 }
  0x13   :  { %497 = dma.done.wait [#allocation12], 512  }
  0x14   :  { %498 = vsyncadd [#allocation12], 4294966784  ;;  %vm98_vm0 = vcmask 261120   ;;  %v509_v0 = vmov 0.0   ;;  %v185_v1 = vld [vmem:[#allocation11 + $0x18] sm:$0xff]  ;;  %v184_v2 = vld [vmem:[#allocation11 + $0x10] sm:$0xff] }
  0x15   :  { %101 = vst.msk [vmem:[#allocation3] sm:$0xff] %vm98_vm0, %v509_v0  ;;  %198 = vmatpush.msra.mxu2 %v185_v1  ;;  %v152_v3 = vld [vmem:[#allocation10 + $0x18] sm:$0xff]  ;;  %v151_v4 = vld [vmem:[#allocation10 + $0x10] sm:$0xff]  ;;  %v183_v5 = vld [vmem:[#allocation11 + $0x8] sm:$0xff]  ;;  %s252_s15 = sshll.u32 %s645_s7, 4  ;;  %s512_s7 = smov [#allocation16]   ;;  %s253_s15 = int_to_ptr.hbm [resolvable:$true] %s252_s15 }
  0x16   :  { %99 = vst.msk [vmem:[#allocation2] sm:$0xff] %vm98_vm0, %v509_v0  ;;  %165 = vmatpush.msra.mxu1 %v152_v3  ;;  %v112_v6 = vld [vmem:[#allocation8 + $0x18] sm:$0xff]  ;;  %v182_v7 = vld [vmem:[#allocation11] sm:$0xff]  ;;  %v150_v8 = vld [vmem:[#allocation10 + $0x8] sm:$0xff]  ;;  %s276_s21 = sshll.u32 %s512_s7, 4  ;;  %s277_s21 = int_to_ptr.vmem [resolvable:$true] %s276_s21 }
  0x17   :  { %100 = vst.msk [vmem:[#allocation2 + $0x8] sm:$0xff] %vm98_vm0, %v509_v0  ;;  %199 = vmatpush.msra.mxu2 %v184_v2  ;;  %308 = vmatpush.msra.mxu3 %v112_v6  ;;  %v111_v9 = vld [vmem:[#allocation8 + $0x10] sm:$0xff]  ;;  %v149_v11 = vld [vmem:[#allocation10] sm:$0xff]  ;;  %v110_v12 = vld [vmem:[#allocation8 + $0x8] sm:$0xff] }
  0x18   :  { %102 = vst.msk [vmem:[#allocation3 + $0x8] sm:$0xff] %vm98_vm0, %v509_v0  ;;  %166 = vmatpush.msra.mxu1 %v151_v4  ;;  %v105_v10 = vld [vmem:[#allocation5] sm:$0xff]  ;;  %132 = vmatpush.msra.mxu0 %v112_v6  ;;  %v109_v13 = vld [vmem:[#allocation8] sm:$0xff]  ;;  %v106_v14 = vld [vmem:[#allocation5 + $0x8] sm:$0xff] }
  0x19   :  { %103 = vst.msk [vmem:[#allocation4] sm:$0xff] %vm98_vm0, %v509_v0  ;;  %200 = vmatpush.msra.mxu2 %v183_v5  ;;  %309 = vmatpush.msra.mxu3 %v111_v9  ;;  %v322_v27 = vld [vmem:[%s643_s5] ss:$0 sm:$0xff]  ;;  %s510_s5 = smov [#allocation13]  }
  0x1a   :  { %104 = vst.msk [vmem:[#allocation4 + $0x8] sm:$0xff] %vm98_vm0, %v509_v0  ;;  %167 = vmatpush.msra.mxu1 %v150_v8  ;;  %133 = vmatpush.msra.mxu0 %v111_v9  ;;  %v323_v34 = vld [vmem:[%s642_s4] ss:$0 sm:$0xff]  ;;  %s250_s12 = sshll.u32 %s510_s5, 4  ;;  %s511_s4 = smov [#allocation14]   ;;  %s251_s12 = int_to_ptr.vmem [resolvable:$true] %s250_s12 }
  0x1b   :  { %201 = vmatpush.msra.mxu2 %v182_v7  ;;  %310 = vmatpush.msra.mxu3 %v110_v12  ;;  %v324_v35 = vld [vmem:[%s644_s6] ss:$0 sm:$0xff]  ;;  %s263_s16 = sshll.u32 %s511_s4, 4  ;;  %s265_s6 = sshll.u32 %s646_s8, 4  ;;  %s264_s16 = int_to_ptr.vmem [resolvable:$true] %s263_s16  ;;  %s266_s6 = int_to_ptr.hbm [resolvable:$true] %s265_s6 }
  0x1c   :  { %306 = vmatmul.msk.f32.vlgmr.msra.gmra.mxu2 %vm98_vm0, %v105_v10  ;;  %168 = vmatpush.msra.mxu1 %v149_v11  ;;  %v147_v15 = vld [vmem:[#allocation3] sm:$0xff]  ;;  %s278_s8 = sshll.u32 %s647_s9, 4  ;;  %s279_s8 = int_to_ptr.hbm [resolvable:$true] %s278_s8 }
  0x1d   :  { %304 = vmatmul.msk.f32.vlgmr.msra.gmra.mxu1 %vm98_vm0, %v105_v10  ;;  %311 = vmatpush.msra.mxu3 %v109_v13  ;;  %v107_v18 = vld [vmem:[#allocation2] sm:$0xff] }
  0x1e   :  { %303 = vmatmul.msk.f32.vlgmr.msra.gmra.mxu3 %vm98_vm0, %v106_v14  ;;  %134 = vmatpush.msra.mxu0 %v110_v12  ;;  %v108_v23 = vld [vmem:[#allocation2 + $0x8] sm:$0xff] }
  0x1f   :  { %v148_v25 = vld [vmem:[#allocation3 + $0x8] sm:$0xff] }
  0x20   :  { %135 = vmatpush.msra.mxu0 %v109_v13  ;;  %v180_v19 = vld [vmem:[#allocation4] sm:$0xff] }
  0x21   :  { %302 = vmatmul.msk.f32.vlgmr.msra.gmra.mxu0 %vm98_vm0, %v105_v10  ;;  %v181_v32 = vld [vmem:[#allocation4 + $0x8] sm:$0xff] }
  0x24   :  { %307 = vmatmul.msk.f32.gmra.mxu2 %vm98_vm0, %v106_v14 }
  0x25   :  { %305 = vmatmul.msk.f32.gmra.mxu1 %vm98_vm0, %v106_v14 }
  0x9a   :  { %v170_v16 = vpop.f32.mrf.mxu1 }
  0x9b   :  { %v176_v17 = vadd.f32 %v170_v16, %v147_v15 }
  0x9d   :  { %178 = vst.msk [vmem:[#allocation3] sm:$0xff] %vm98_vm0, %v176_v17 }
  0x9e   :  { %v137_v20 = vpop.f32.mrf.mxu0 }
  0x9f   :  { %v203_v21 = vpop.f32.mrf.mxu2  ;;  %v143_v22 = vadd.f32 %v137_v20, %v107_v18 }
  0xa0   :  { %v209_v24 = vadd.f32 %v203_v21, %v180_v19 }
  0xa1   :  { %145 = vst.msk [vmem:[#allocation2] sm:$0xff] %vm98_vm0, %v143_v22  ;;  %v140_v26 = vpop.f32.mrf.mxu3 }
  0xa2   :  { %211 = vst.msk [vmem:[#allocation4] sm:$0xff] %vm98_vm0, %v209_v24  ;;  %v173_v28 = vpop.f32.mrf.mxu1  ;;  %v144_v29 = vadd.f32 %v140_v26, %v108_v23 }
  0xa3   :  { %v177_v30 = vadd.f32 %v173_v28, %v148_v25 }
  0xa4   :  { %146 = vst.msk [vmem:[#allocation2 + $0x8] sm:$0xff] %vm98_vm0, %v144_v29  ;;  %v226_v31 = vld [vmem:[#allocation3] sm:$0xff] }
  0xa5   :  { %179 = vst.msk [vmem:[#allocation3 + $0x8] sm:$0xff] %vm98_vm0, %v177_v30  ;;  %v232_v33 = vadd.f32 %v322_v27, %v226_v31 }
  0xa7   :  { %v206_v36 = vpop.f32.mrf.mxu2  ;;  %234 = vst.msk [vmem:[#allocation14] sm:$0xff] %vm98_vm0, %v232_v33 }
  0xa8   :  { %v210_v37 = vadd.f32 %v206_v36, %v181_v32  ;;  %v216_v38 = vld [vmem:[#allocation2] sm:$0xff] }
  0xa9   :  { %v222_v39 = vadd.f32 %v323_v34, %v216_v38  ;;  %v236_v40 = vld [vmem:[#allocation4] sm:$0xff] }
  0xaa   :  { %212 = vst.msk [vmem:[#allocation4 + $0x8] sm:$0xff] %vm98_vm0, %v210_v37  ;;  %v242_v41 = vadd.f32 %v324_v35, %v236_v40 }
  0xab   :  { %v217_v42 = vld [vmem:[#allocation2 + $0x8] sm:$0xff]  ;;  %224 = vst.msk [vmem:[#allocation13] sm:$0xff] %vm98_vm0, %v222_v39 }
  0xac   :  { %v227_v43 = vld [vmem:[#allocation3 + $0x8] sm:$0xff]  ;;  %v223_v44 = vadd.f32 %v323_v34, %v217_v42  ;;  %244 = vst.msk [vmem:[#allocation16] sm:$0xff] %vm98_vm0, %v242_v41 }
  0xad   :  { %v233_v45 = vadd.f32 %v322_v27, %v227_v43 }
  0xae   :  { %225 = vst.msk [vmem:[#allocation13 + $0x8] sm:$0xff] %vm98_vm0, %v223_v44 }
  0xaf   :  { %235 = vst.msk [vmem:[#allocation14 + $0x8] sm:$0xff] %vm98_vm0, %v233_v45  ;;  %258 = dma.vmem_to_hbm [thread:$0]  %s251_s12, 256, %s253_s15, [#allocation7], %s504_s17, %s504_s17, %s505_s18  }
  0xb0   :  { %271 = dma.vmem_to_hbm [thread:$0]  %s264_s16, 256, %s266_s6, [#allocation15], %s504_s17, %s504_s17, %s505_s18  }
  0xb1   :  { %v237_v46 = vld [vmem:[#allocation4 + $0x8] sm:$0xff] }
  0xb2   :  { %v243_v47 = vadd.f32 %v324_v35, %v237_v46 }
  0xb4   :  { %245 = vst.msk [vmem:[#allocation16 + $0x8] sm:$0xff] %vm98_vm0, %v243_v47 }
  0xb5   :  { %284 = dma.vmem_to_hbm [thread:$0]  %s277_s21, 256, %s279_s8, [#allocation15], %s504_s17, %s504_s17, %s505_s18  }
  0xb6   :  { %499 = dma.done.wait [#allocation7], 256  }
  0xb7   :  { %500 = vsyncadd [#allocation7], 4294967040 }
  0xb8   :  { %501 = dma.done.wait [#allocation15], 512  }
  0xb9   :  { %502 = vsyncadd [#allocation15], 4294966784 }
  0xba   :  { %297 = vsyncpa [#allocation6], 1 }
  0xbb   :  { %298 = vsyncpa [#allocation9], 1 }
  0xbc   :  { %299 = vsyncpa [#allocation12], 1 }
  0xbd   :  { %300 = vsyncpa [#allocation7], 1 }
  0xbe   :  { %301 = vsyncpa [#allocation15], 1 }

</bundles_post_ra>
